<compile_context>
chip_gen: v6e
topology: v6e:2x2x1
jax: 0.10.0
libtpu: 0.0.40
codegen_flags: <defaults>
</compile_context>

<pallas_src>
import functools

import jax
import jax.numpy as jnp
from jax.experimental import pallas as pl
from jax.experimental.pallas import tpu as pltpu


BN_EPS = 1e-5       # PyTorch BatchNorm1d default eps
LANE = 128          # TPU lane width
NEG_BIAS = -1e30    # bias for padded logits -> softmax ~ 0


def _round_up(x: int, m: int) -> int:
    return ((x + m - 1) // m) * m


# --------------------------------------------------------------------------- #
# Kernel 1: per-tile hidden pre-activation + full-batch sum / sum-of-squares.
# Grid = (core_split=2 "parallel", row_tiles "arbitrary").  Each core-slot
# accumulates directly into its own resident (2, H) output block.
# --------------------------------------------------------------------------- #
def stats_kernel(x_ref, w1_ref, b1_ref, stats_ref, *,
                 n_valid, tile_n, offset, skip_first):
    cix = pl.program_id(0)   # core-split axis
    i = pl.program_id(1)     # row-tile (reduction) axis

    @pl.when(i == 0)
    def _init():
        stats_ref[...] = jnp.zeros_like(stats_ref)

    # Linear 1 (MXU) + bias.
    h = jnp.dot(x_ref[...], w1_ref[...], preferred_element_type=jnp.float32)
    h = h + b1_ref[...]

    # Global (un-clamped) tile index this step maps to.  Core 1 starts at tile
    # `offset = nt - nt_half`, so when the tile count is odd its first tile
    # duplicates core 0's last tile; `skip_first` masks that duplicate.
    tile_global = cix * offset + i
    row = (jax.lax.broadcasted_iota(jnp.int32, (h.shape[0], 1), 0)
           + tile_global * tile_n)
    valid = row < n_valid                      # masks batch-padding / ragged rows
    if skip_first:
        dup_ok = jnp.logical_or(cix == 0, i >= skip_first)
        valid = jnp.logical_and(valid, dup_ok)
    hm = jnp.where(valid, h, 0.0)

    # Accumulate straight into the resident output block (no scratch / concat).
    stats_ref[0:1, :] += jnp.sum(hm, axis=0, keepdims=True)
    stats_ref[1:2, :] += jnp.sum(hm * hm, axis=0, keepdims=True)


# --------------------------------------------------------------------------- #
# Kernel 2: folded BN scale/shift + ELU + Linear 2 + softmax.  Output block is
# narrow (tile_n, C): ~64x fewer writeback bytes than a 128-lane padded store.
# --------------------------------------------------------------------------- #
def head_kernel(x_ref, w1_ref, w2_ref, p_ref, o_ref):
    # Linear 1 (MXU); bias is folded into the BN shift.
    h = jnp.dot(x_ref[...], w1_ref[...], preferred_element_type=jnp.float32)

    hp = h.shape[1]            # padded hidden width (multiple of 128)
    cp = w2_ref.shape[1]       # padded class width  (multiple of 128)
    c_real = o_ref.shape[1]    # real number of classes
    scale = p_ref[0:1, :hp]    # gamma * inv_std
    shift = p_ref[1:2, :hp]    # beta + (b1 - mean) * scale
    b2 = p_ref[2:3, :cp]       # padded classes biased to -1e30

    # Folded BatchNorm (single multiply-add) + ELU(alpha=1).
    h = h * scale + shift
    h = jnp.where(h > 0, h, jnp.exp(h) - 1.0)

    # Linear 2 (MXU) + softmax over the lane-dense padded class dim.
    z = jnp.dot(h, w2_ref[...], preferred_element_type=jnp.float32) + b2
    z_max = jnp.max(z, axis=-1, keepdims=True)
    e = jnp.exp(z - z_max)
    denom = jnp.sum(e, axis=-1, keepdims=True)
    r = pl.reciprocal(denom, approx=True)      # EUP slot (otherwise idle)
    r = r * (2.0 - denom * r)                  # one Newton step -> full precision
    # Narrow store: only the real classes go back to HBM.
    o_ref[...] = (e * r)[:, :c_real]


# --------------------------------------------------------------------------- #
# Wrapper
# --------------------------------------------------------------------------- #
def propensity_net_forward(x, params, *, tile_n=None, stats_tile_n=None):
    """x: [N, Din] float32.  params: dict of weights stored as [in, out]."""
    n, din = x.shape
    h_dim = params["w1"].shape[1]
    c = params["w2"].shape[1]

    h_pad = _round_up(h_dim, LANE)
    c_pad = _round_up(c, LANE)
    pw = max(h_pad, c_pad)

    # Row tiles: large enough to amortize the ~0.35us per-grid-step overhead,
    # multiples of 8 sublanes, small enough to sit in every generation's default
    # scoped VMEM with double buffering.
    if tile_n is None:
        tile_n = min(1024, _round_up(n, 8))
    tile_n = _round_up(tile_n, 8)
    if stats_tile_n is None:
        stats_tile_n = min(2048, _round_up(n, 8))
    stats_tile_n = _round_up(stats_tile_n, 8)

    f32 = jnp.float32
    x32 = x.astype(f32)                        # no batch padding / no extra copy
    w1_p = jnp.pad(params["w1"].astype(f32), ((0, 0), (0, h_pad - h_dim)))
    b1_p = jnp.pad(params["b1"].astype(f32), ((0, 0), (0, h_pad - h_dim)))
    gamma_p = jnp.pad(params["gamma"].astype(f32), ((0, 0), (0, h_pad - h_dim)))
    beta_p = jnp.pad(params["beta"].astype(f32), ((0, 0), (0, h_pad - h_dim)))
    w2_p = jnp.pad(params["w2"].astype(f32),
                   ((0, h_pad - h_dim), (0, c_pad - c)))
    b2_p = jnp.pad(params["b2"].astype(f32), ((0, 0), (0, c_pad - c)),
                   constant_values=NEG_BIAS)

    # ---- Phase 1: full-batch BatchNorm statistics, split across 2 core slots. ----
    nt = pl.cdiv(n, stats_tile_n)
    nt_half = (nt + 1) // 2
    offset = nt - nt_half            # core 1 starting tile (always in-bounds)
    skip_first = 2 * nt_half - nt    # 1 when nt is odd -> core 1's first tile is a dup

    partial = pl.pallas_call(
        functools.partial(stats_kernel, n_valid=n, tile_n=stats_tile_n,
                          offset=offset, skip_first=skip_first),
        out_shape=jax.ShapeDtypeStruct((2, 2, h_pad), f32),
        grid_spec=pltpu.PrefetchScalarGridSpec(
            num_scalar_prefetch=0,
            grid=(2, nt_half),
            in_specs=[
                pl.BlockSpec((stats_tile_n, din),
                             lambda cix, i: (cix * offset + i, 0)),   # X row tile
                pl.BlockSpec((din, h_pad), lambda cix, i: (0, 0)),    # W1 (resident)
                pl.BlockSpec((1, h_pad), lambda cix, i: (0, 0)),      # b1 (resident)
            ],
            out_specs=pl.BlockSpec((None, 2, h_pad),
                                   lambda cix, i: (cix, 0, 0)),       # per-core partial
        ),
        compiler_params=pltpu.CompilerParams(
            dimension_semantics=("parallel", "arbitrary")),  # v7x: one half per TC
    )(x32, w1_p, b1_p)

    stats = jnp.sum(partial, axis=0)          # combine the two core partials

    # Fold BatchNorm (training mode: batch stats, biased variance) + b1 into a
    # single per-feature scale/shift.  O(H) work, done once on the host graph.
    mean = stats[0:1, :] / n
    var = jnp.maximum(stats[1:2, :] / n - mean * mean, 0.0)
    inv_std = jax.lax.rsqrt(var + BN_EPS)
    scale = gamma_p * inv_std
    shift = beta_p + (b1_p - mean) * scale

    # Pack the small per-feature params into a single slab -> one parameter DMA.
    def _row(v):
        return jnp.pad(v, ((0, 0), (0, pw - v.shape[1])))
    packed = jnp.concatenate([_row(scale), _row(shift), _row(b2_p)], axis=0)

    # ---- Phase 2: BN/ELU/Linear2/softmax per row tile (fully parallel). ----
    nt_head = pl.cdiv(n, tile_n)
    out = pl.pallas_call(
        head_kernel,
        out_shape=jax.ShapeDtypeStruct((n, c), f32),      # narrow: real classes only
        grid_spec=pltpu.PrefetchScalarGridSpec(
            num_scalar_prefetch=0,
            grid=(nt_head,),
            in_specs=[
                pl.BlockSpec((tile_n, din), lambda i: (i, 0)),    # X row tile
                pl.BlockSpec((din, h_pad), lambda i: (0, 0)),     # W1 (resident)
                pl.BlockSpec((h_pad, c_pad), lambda i: (0, 0)),   # W2 (resident)
                pl.BlockSpec((3, pw), lambda i: (0, 0)),          # packed params
            ],
            out_specs=pl.BlockSpec((tile_n, c), lambda i: (i, 0)),
        ),
        compiler_params=pltpu.CompilerParams(
            dimension_semantics=("parallel",)),   # v7x: split row tiles across TCs
    )(x32, w1_p, w2_p, packed)

    return out


# --------------------------------------------------------------------------- #
# Deterministic synthetic init (shapes match nn.Linear / nn.BatchNorm1d)
# --------------------------------------------------------------------------- #
def init_params(key, n_unit_in, n_units_out_prop, n_unit_out):
    k1, k2, k3, k4 = jax.random.split(key, 4)
    bound1 = 1.0 / jnp.sqrt(n_unit_in)
    bound2 = 1.0 / jnp.sqrt(n_units_out_prop)
    return {
        # Linear 1: stored transposed -> [in, out]
        "w1": jax.random.uniform(k1, (n_unit_in, n_units_out_prop),
                                 jnp.float32, -bound1, bound1),
        "b1": jax.random.uniform(k2, (1, n_units_out_prop),
                                 jnp.float32, -bound1, bound1),
        # BatchNorm1d affine params (PyTorch init: gamma=1, beta=0)
        "gamma": jnp.ones((1, n_units_out_prop), jnp.float32),
        "beta": jnp.zeros((1, n_units_out_prop), jnp.float32),
        # Linear 2: [in, out]
        "w2": jax.random.uniform(k3, (n_units_out_prop, n_unit_out),
                                 jnp.float32, -bound2, bound2),
        "b2": jax.random.uniform(k4, (1, n_unit_out),
                                 jnp.float32, -bound2, bound2),
    }


def reference_forward(x, p):
    h = x @ p["w1"] + p["b1"]
    mean = jnp.mean(h, axis=0, keepdims=True)
    var = jnp.mean((h - mean) ** 2, axis=0, keepdims=True)
    h = p["gamma"] * (h - mean) / jnp.sqrt(var + BN_EPS) + p["beta"]
    h = jnp.where(h > 0, h, jnp.exp(h) - 1.0)
    z = h @ p["w2"] + p["b2"]
    return jax.nn.softmax(z, axis=-1)


if __name__ == "__main__":
    key = jax.random.PRNGKey(0)
    k_x1, k_x2, k_p = jax.random.split(key, 3)

    n_unit_in, n_units_out_prop, n_unit_out = 16, 32, 2
    params = init_params(k_p, n_unit_in, n_units_out_prop, n_unit_out)

    # Config 1: multi-tile grids with ragged last tiles and an odd stats-tile
    # count (exercises the 2-way split, overlap masking and padded-row masking).
    x1 = jax.random.normal(k_x1, (40, n_unit_in), jnp.float32)
    out1 = jax.block_until_ready(
        propensity_net_forward(x1, params, tile_n=16, stats_tile_n=16))
    ref1 = reference_forward(x1, params)
    assert out1.shape == (40, n_unit_out)
    assert jnp.allclose(out1, ref1, atol=1e-5, rtol=1e-4), "mismatch (multi-tile)"
    assert jnp.allclose(jnp.sum(out1, axis=-1), 1.0, atol=1e-5)

    # Config 2: tiny batch, single tile, default tiling.
    x2 = jax.random.normal(k_x2, (8, n_unit_in), jnp.float32)
    out2 = jax.block_until_ready(propensity_net_forward(x2, params))
    ref2 = reference_forward(x2, params)
    assert out2.shape == (8, n_unit_out)
    assert jnp.allclose(out2, ref2, atol=1e-5, rtol=1e-4), "mismatch (single-tile)"
    assert jnp.allclose(jnp.sum(out2, axis=-1), 1.0, atol=1e-5)

    print("KERNEL_OK")
</pallas_src>

<mosaic_0001>
module attributes {stable_mosaic.version = 11 : i64} {
  func.func @stats_kernel(%arg0: i32, %arg1: i32, %arg2: memref<16x16xf32, #tpu.memory_space<vmem>>, %arg3: memref<16x128xf32, #tpu.memory_space<vmem>>, %arg4: memref<1x128xf32, #tpu.memory_space<vmem>>, %arg5: memref<1x2x128xf32, #tpu.memory_space<vmem>>) attributes {dimension_semantics = [#tpu.dimension_semantics<parallel>, #tpu.dimension_semantics<arbitrary>], iteration_bounds = array<i64: 2, 2>, scalar_prefetch = 0 : i64, scratch_operands = 0 : i64, tpu.core_type = #tpu.core_type<tc>, window_params = [{transform_indices = @transform_0, window_bounds = array<i64: 16, 16>}, {pipeline_mode = #tpu.pipeline_mode<synchronous>, transform_indices = @transform_1, window_bounds = array<i64: 16, 128>}, {pipeline_mode = #tpu.pipeline_mode<synchronous>, transform_indices = @transform_2, window_bounds = array<i64: 1, 128>}, {transform_indices = @transform_3, window_bounds = array<i64: 1, 2, 128>}]} {
    %c0_i32 = arith.constant 0 : i32
    %0 = arith.cmpi eq, %arg1, %c0_i32 : i32
    %1 = arith.extui %0 : i1 to i32
    %c0_i32_0 = arith.constant 0 : i32
    %2 = arith.cmpi ne, %1, %c0_i32_0 : i32
    scf.if %2 {
      %cst_22 = arith.constant 0.000000e+00 : f32
      %43 = vector.broadcast %cst_22 : f32 to vector<2x128xf32>
      %c0_23 = arith.constant 0 : index
      %c0_24 = arith.constant 0 : index
      %c0_25 = arith.constant 0 : index
      %44 = vector.load %arg5[%c0_23, %c0_24, %c0_25] : memref<1x2x128xf32, #tpu.memory_space<vmem>>, vector<1x2x128xf32>
      %45 = vector.shape_cast %44 : vector<1x2x128xf32> to vector<2x128xf32>
      %46 = vector.shape_cast %43 : vector<2x128xf32> to vector<1x2x128xf32>
      tpu.vector_store %arg5[%c0_23, %c0_24, %c0_25], %46 {strides = array<i32>} : memref<1x2x128xf32, #tpu.memory_space<vmem>>, vector<1x2x128xf32>,
    } else {
    }
    %c0 = arith.constant 0 : index
    %c0_1 = arith.constant 0 : index
    %3 = vector.load %arg2[%c0, %c0_1] : memref<16x16xf32, #tpu.memory_space<vmem>>, vector<16x16xf32>
    %c0_2 = arith.constant 0 : index
    %c0_3 = arith.constant 0 : index
    %4 = vector.load %arg3[%c0_2, %c0_3] : memref<16x128xf32, #tpu.memory_space<vmem>>, vector<16x128xf32>
    %cst = arith.constant dense<0.000000e+00> : vector<16x128xf32>
    %5 = tpu.matmul %3, %4, %cst {dimension_numbers = #tpu.dot_dimension_numbers<[1], [0], [0], [1], [0, 0, 1, 1], [], []>} : vector<16x16xf32>, vector<16x128xf32>, vector<16x128xf32> -> vector<16x128xf32>
    %c0_4 = arith.constant 0 : index
    %c0_5 = arith.constant 0 : index
    %6 = vector.load %arg4[%c0_4, %c0_5] : memref<1x128xf32, #tpu.memory_space<vmem>>, vector<1x128xf32>
    %7 = vector.broadcast %6 : vector<1x128xf32> to vector<16x128xf32>
    %8 = arith.addf %5, %7 : vector<16x128xf32>
    %c1_i32 = arith.constant 1 : i32
    %9 = arith.muli %arg0, %c1_i32 : i32
    %10 = arith.addi %9, %arg1 : i32
    %11 = tpu.iota {dimensions = array<i32: 0>} : vector<16x1xi32>
    %c16_i32 = arith.constant 16 : i32
    %12 = arith.muli %10, %c16_i32 : i32
    %13 = vector.broadcast %12 : i32 to vector<16x1xi32>
    %14 = arith.addi %11, %13 : vector<16x1xi32>
    %c40_i32 = arith.constant 40 : i32
    %15 = vector.broadcast %c40_i32 : i32 to vector<16x1xi32>
    %16 = arith.cmpi slt, %14, %15 : vector<16x1xi32>
    %c0_i32_6 = arith.constant 0 : i32
    %17 = arith.cmpi eq, %arg0, %c0_i32_6 : i32
    %c1_i32_7 = arith.constant 1 : i32
    %18 = arith.cmpi sge, %arg1, %c1_i32_7 : i32
    %19 = arith.ori %17, %18 : i1
    %20 = vector.broadcast %19 : i1 to vector<16x1xi1>
    %21 = arith.andi %16, %20 : vector<16x1xi1>
    %cst_8 = arith.constant 0.000000e+00 : f32
    %22 = vector.shape_cast %21 : vector<16x1xi1> to vector<16x1xi1>
    %23 = vector.broadcast %22 : vector<16x1xi1> to vector<16x128xi1>
    %24 = vector.broadcast %cst_8 : f32 to vector<16x128xf32>
    %25 = arith.select %23, %8, %24 : vector<16x128xi1>, vector<16x128xf32>
    %c0_9 = arith.constant 0 : index
    %c0_10 = arith.constant 0 : index
    %c0_11 = arith.constant 0 : index
    %26 = vector.load %arg5[%c0_9, %c0_10, %c0_11] : memref<1x2x128xf32, #tpu.memory_space<vmem>>, vector<1x1x128xf32>
    %27 = vector.shape_cast %26 : vector<1x1x128xf32> to vector<1x128xf32>
    %cst_12 = arith.constant dense<0.000000e+00> : vector<128xf32>
    %28 = vector.multi_reduction <add>, %25, %cst_12 [0] : vector<16x128xf32> to vector<128xf32>
    %29 = vector.shape_cast %28 : vector<128xf32> to vector<1x128xf32>
    %30 = arith.addf %27, %29 : vector<1x128xf32>
    %c0_13 = arith.constant 0 : index
    %c0_14 = arith.constant 0 : index
    %c0_15 = arith.constant 0 : index
    %31 = vector.load %arg5[%c0_13, %c0_14, %c0_15] : memref<1x2x128xf32, #tpu.memory_space<vmem>>, vector<1x1x128xf32>
    %32 = vector.shape_cast %31 : vector<1x1x128xf32> to vector<1x128xf32>
    %33 = vector.shape_cast %30 : vector<1x128xf32> to vector<1x1x128xf32>
    tpu.vector_store %arg5[%c0_13, %c0_14, %c0_15], %33 {strides = array<i32>} : memref<1x2x128xf32, #tpu.memory_space<vmem>>, vector<1x1x128xf32>,
    %c0_16 = arith.constant 0 : index
    %c1 = arith.constant 1 : index
    %c0_17 = arith.constant 0 : index
    %34 = vector.load %arg5[%c0_16, %c1, %c0_17] : memref<1x2x128xf32, #tpu.memory_space<vmem>>, vector<1x1x128xf32>
    %35 = vector.shape_cast %34 : vector<1x1x128xf32> to vector<1x128xf32>
    %36 = arith.mulf %25, %25 : vector<16x128xf32>
    %cst_18 = arith.constant dense<0.000000e+00> : vector<128xf32>
    %37 = vector.multi_reduction <add>, %36, %cst_18 [0] : vector<16x128xf32> to vector<128xf32>
    %38 = vector.shape_cast %37 : vector<128xf32> to vector<1x128xf32>
    %39 = arith.addf %35, %38 : vector<1x128xf32>
    %c0_19 = arith.constant 0 : index
    %c1_20 = arith.constant 1 : index
    %c0_21 = arith.constant 0 : index
    %40 = vector.load %arg5[%c0_19, %c1_20, %c0_21] : memref<1x2x128xf32, #tpu.memory_space<vmem>>, vector<1x1x128xf32>
    %41 = vector.shape_cast %40 : vector<1x1x128xf32> to vector<1x128xf32>
    %42 = vector.shape_cast %39 : vector<1x128xf32> to vector<1x1x128xf32>
    tpu.vector_store %arg5[%c0_19, %c1_20, %c0_21], %42 {strides = array<i32>} : memref<1x2x128xf32, #tpu.memory_space<vmem>>, vector<1x1x128xf32>,
    return
  }
  func.func @transform_0(%arg0: i32, %arg1: i32) -> (i32, i32) {
    %c1_i32 = arith.constant 1 : i32
    %0 = arith.muli %arg0, %c1_i32 : i32
    %1 = arith.addi %0, %arg1 : i32
    %c0_i32 = arith.constant 0 : i32
    %c0_i32_0 = arith.constant 0 : i32
    return %1, %c0_i32 : i32, i32
  }
  func.func @transform_1(%arg0: i32, %arg1: i32) -> (i32, i32) {
    %c0_i32 = arith.constant 0 : i32
    %c0_i32_0 = arith.constant 0 : i32
    %c0_i32_1 = arith.constant 0 : i32
    return %c0_i32, %c0_i32_0 : i32, i32
  }
  func.func @transform_2(%arg0: i32, %arg1: i32) -> (i32, i32) {
    %c0_i32 = arith.constant 0 : i32
    %c0_i32_0 = arith.constant 0 : i32
    %c0_i32_1 = arith.constant 0 : i32
    return %c0_i32, %c0_i32_0 : i32, i32
  }
  func.func @transform_3(%arg0: i32, %arg1: i32) -> (i32, i32, i32) {
    %c0_i32 = arith.constant 0 : i32
    %c0_i32_0 = arith.constant 0 : i32
    %c0_i32_1 = arith.constant 0 : i32
    return %arg0, %c0_i32, %c0_i32_0 : i32, i32, i32
  }
}

</mosaic_0001>

<bundles_post_ra>
// kernel: tpu_custom_call.1
= control target key start
LH: loop header
LB: loop body
LE: loop exit
PB: predicated region body
PF: predicated region fallthrough
CT: control target
= control target key end

     0   :  { %8 = vsyncpa [#allocation3], 0  ;;  %s801_s0 = inlined_call_operand.vmem [shape: f32[40,16], index: 0, kind: input, shape index: {}]   ;;  %s802_s1 = inlined_call_operand.vmem [shape: f32[16,128], index: 1, kind: input, shape index: {}]   ;;  %s803_s2 = inlined_call_operand.vmem [shape: f32[1,128], index: 2, kind: input, shape index: {}]   ;;  %s804_s3 = inlined_call_operand.hbm [shape: f32[2,2,128], index: 3, kind: output, shape index: {}]  }
   0x1   :  { %10 = vsyncpa [#allocation3 + $0x1], 0  ;;  %s654_s12 = smov 0   ;;  %s656_s13 = smov 0  }
   0x2   :  { %s658_s14 = smov 0   ;;  %s660_s15 = smov 0  }
   0x3   :  { %s662_s16 = smov 0   ;;  %s664_s17 = smov 0  }
   0x4   :  { %s666_s18 = smov 0   ;;  %s668_s19 = smov 0  }
   0x5 LB: > { %s438_s20 = sadd.s32 4294967295, %s630_s19   ;;  %s439_s21 = sadd.s32 4294967294, %s630_s19   ;;  %s630_s19 = sphi %s668_s19, %s16_s19   ;;  %s626_s18 = sphi %s666_s18, %s813_s18   ;;  %s622_s17 = sphi %s664_s17, %s812_s17   ;;  %s618_s16 = sphi %s662_s16, %s811_s16   ;;  %s614_s15 = sphi %s660_s15, %s810_s15   ;;  %s610_s14 = sphi %s658_s14, %s809_s14   ;;  %s606_s13 = sphi %s656_s13, %s808_s13   ;;  %s602_s12 = sphi %s654_s12, %s807_s12  }
   0x6   : > { %s25_s22 = sadd.s32 1, %s622_s17  ;;  %s28_s23 = sadd.s32 1, %s626_s18 }
   0x7   : > { %p26_p0 = scmp.ge.s32.totalorder %s25_s22, 2  ;;  %p115_p1 = scmp.ne.s32.totalorder %s610_s14, %s606_s13 }
   0x8   : > { %p116_p2 = scmp.eq.s32.totalorder %s438_s20, 3  ;;  %p121_p4 = scmp.ne.s32.totalorder %s606_s13, %s602_s12 }
   0x9   : > { %s815_s22 = smov (%p26_p0, %s25_s22), 0  ;;  %s817_s23 = smov (!%p26_p0, %s28_s23), %s626_s18 }
   0xa   : > { %p703_p3 = por %p116_p2, %p115_p1  ;;  %p30_p5 = scmp.ge.s32.totalorder %s817_s23, 2 }
   0xb   : > { %p122_p6 = scmp.eq.s32.totalorder %s439_s21, 3  ;;  %p442_p7 = scmp.ge.s32.totalorder %s630_s19, 1 }
   0xc   : > { %p165_p8 = scmp.lt.s32.totalorder %s630_s19, 5  ;;  %s819_s23 = smov (%p30_p5, %s817_s23), 0 }
   0xd   : > { %p713_p9 = por %p122_p6, %p121_p4  ;;  %s102_s26 = ssub.s32 %s626_s18, %s819_s23 }
   0xe   : > { %p166_p10 = pnand %p442_p7, %p165_p8  ;;  %s105_s27 = sadd.s32 1, %s610_s14 }
   0xf   : > { %p103_p11 = scmp.eq.s32.totalorder %s102_s26, 0  ;;  %s191_s29 = sand.u32 (!%p166_p10), 1, %s606_s13  }
  0x10   : > { %169 = sbr.rel (%p166_p10) target bundleno = 263 (0x107), region = 32  ;;  %s726_s30 = sadd.s32 (!%p166_p10), %s614_s15, %s618_s16 }
  0x11   : > { %s721_s28 = scalar_select %p103_p11, %s610_s14, %s105_s27  }
  0x12   : > { %s443_s4 = sshll.u32 (!%p166_p10), %s191_s29, 1  ;;  %s444_s5 = sshll.u32 (!%p166_p10), %s726_s30, 1 }
  0x13   : > { %p200_p12 = scmp.lt.s32.totalorder (!%p166_p10), %s444_s5, 4  ;;  %s734_s10 = scalar_lea.vmem (!%p166_p10), [#allocation2], %s443_s4 }
  0x14   : > { %p446_p13 = scmp.ne.s32.totalorder (!%p166_p10), %s614_s15, 0 }
  0x15   : > { %s821_s5 = smov (!%p200_p12, %s444_s5), 4 }
  0x16   : > { %s445_s6 = sshll.u32 %s821_s5, 3  ;;  %213 = sbr.rel (%p446_p13) target bundleno = 29 (0x1d), region = 36 }
  0x17   : > { %s203_s9 = scalar_lea.vmem %s801_s0, %s445_s6 }
  0x1b   : > { %v632_v0 = vmov 0.0  }
  0x1c   : > { %214 = vst [vmem:[%s734_s10] sm:$0x3] %v632_v0 }
  0x1d PF: > { %v218_v1 = vld [vmem:[%s802_s1 + $0x8] sm:$0xff]  ;;  %v217_v2 = vld [vmem:[%s802_s1] sm:$0xff]  ;;  %vm226_vm0 = vcmask 130048   ;;  %v309_v5 = vlaneseq  ;;  %p318_p0 = scmp.eq.s32.totalorder %s618_s16, 0  ;;  %p319_p1 = scmp.ge.s32.totalorder %s614_s15, 1 }
  0x1e   : > { %v215_v3 = vld [vmem:[%s203_s9] sm:$0xff]  ;;  %459 = vmatprep.subr.mxu0 %v218_v1  ;;  %v216_v4 = vld [vmem:[%s203_s9 + $0x8] sm:$0xff]  ;;  %s450_s27 = sshll.u32 %s726_s30, 4  ;;  %s452_s15 = sshll.u32 %s618_s16, 5 }
  0x1f   : > { %463 = vmatprep.mubr.msk.f32.mxu0 %vm226_vm0, %v215_v3  ;;  %460 = vmatpush3.msra.mxu0 %v218_v1  ;;  %v310_v6 = vshrl.u32 %v309_v5, 7  ;;  %p320_p2 = por %p319_p1, %p318_p0  ;;  %v313_v8 = vstv %s450_s27  ;;  %v447_v12 = vld [vmem:[%s803_s2] ss:$0 sm:$0xff]  ;;  %s368_s30 = sshll.u32 %s734_s10, 4  ;;  %s369_s30 = int_to_ptr.vmem [resolvable:$true] %s368_s30 }
  0x20   : > { %461 = vmatprep.subr.mxu0 %v217_v2  ;;  %s366_s9 = scalar_lea.hbm %s804_s3, %s452_s15  ;;  %s355_s11 = scalar_lea.sflag [#allocation3], %s191_s29 }
  0x21   : > { %462 = vmatpush3.msra.mxu0 %v217_v2  ;;  %v311_v7 = vadd.s32 8, %v310_v6  ;;  %s321_s4 = scalar_select %p320_p2, 1, 0  ;;  %v314_v11 = vadd.s32 %v313_v8, %v310_v6 }
  0x22   : > { %464 = vmatmul.mubr.msk.f32.vlgmr.msra.gmra.mxu0 %vm226_vm0, %v216_v4  ;;  %s538_s20 = scalar_lea.vmem %s369_s30, 32  ;;  %s633_s21 = smov [#allocation2]  }
  0x23   : > { %v315_v9 = vadd.s32 %v313_v8, %v311_v7  ;;  %v322_v10 = vstv %s321_s4  ;;  %vm316_vm3 = vcmp.lt.s32.totalorder %v314_v11, 40  ;;  %v332_v32 = vld [vmem:[%s734_s10] sm:$0x1]  ;;  %v342_v35 = vld [vmem:[%s734_s10 + $0x1] sm:$0x1]  ;;  %p539_p4 = scmp.ne.s32.totalorder %s369_s30, %s538_s20  ;;  %s542_s16 = sshll.u32 %s633_s21, 4  ;;  %s543_s16 = int_to_ptr.vmem [resolvable:$false] %s542_s16 }
  0x24   : > { %vm323_vm2 = vcmp.eq.s32.totalorder %v322_v10, 1  ;;  %s544_s26 = scalar_lea.vmem %s543_s16, 64  ;;  %p545_p7 = scmp.lt.s32.totalorder %s369_s30, %s543_s16 }
  0x25   : > { %vm317_vm1 = vcmp.lt.s32.totalorder %v315_v9, 40  ;;  %vm324_vm5 = vmand %vm316_vm3, %vm323_vm2  ;;  %p540_p5 = pnand %p539_p4, %p703_p3  ;;  %p546_p8 = scmp.lt.s32.totalorder %s544_s26, %s538_s20 }
  0x26   : > { %vm325_vm4 = vmand %vm317_vm1, %vm323_vm2 }
  0x27   : > { %p541_p6 = pneg %p540_p5  ;;  %p547_p10 = por %p546_p8, %p545_p7 }
  0x29   : > { %p548_p11 = pnand %p547_p10, %p541_p6 }
  0xe2   : > { %v465_v13 = vpop.f32.mrf.mxu0 }
  0xe3   : > { %v305_v14 = vadd.f32 %v465_v13, %v447_v12 }
  0xe4   : > { %v299_v15 = vpop.f32.mrf.mxu0 }
  0xe5   : > { %v331_v16 = vsel %vm325_vm4, %v305_v14, 0.0  ;;  %v300_v17 = vadd.f32 %v447_v12, %v299_v15 }
  0xe6   : > { %v344_v19 = vmul.f32 %v331_v16, %v331_v16 }
  0xe7   : > { %v330_v18 = vsel %vm324_vm5, %v300_v17, 0.0 }
  0xe8   : > { %v333_v20 = vadd.f32 %v331_v16, %v330_v18  ;;  %v343_v21 = vmul.f32 %v330_v18, %v330_v18 }
  0xea   : > { %v334_v22 = vrot.slane %v333_v20, 4  ;;  %v345_v23 = vadd.f32 %v344_v19, %v343_v21 }
  0xec   : > { %v335_v24 = vadd.f32 %v334_v22, %v333_v20  ;;  %v346_v25 = vrot.slane %v345_v23, 4 }
  0xee   : > { %v336_v26 = vrot.slane %v335_v24, 2  ;;  %v347_v27 = vadd.f32 %v346_v25, %v345_v23 }
  0xf0   : > { %v337_v28 = vadd.f32 %v336_v26, %v335_v24  ;;  %v348_v29 = vrot.slane %v347_v27, 2 }
  0xf2   : > { %v338_v30 = vrot.slane %v337_v28, 1  ;;  %v349_v31 = vadd.f32 %v348_v29, %v347_v27 }
  0xf4   : > { %v339_v33 = vadd.f32 %v338_v30, %v337_v28  ;;  %v350_v34 = vrot.slane %v349_v31, 1 }
  0xf6   : > { %v340_v36 = vadd.f32 %v339_v33, %v332_v32  ;;  %v351_v37 = vadd.f32 %v350_v34, %v349_v31 }
  0xf8   : > { %341 = vst [vmem:[%s734_s10] sm:$0x1] %v340_v36  ;;  %v352_v38 = vadd.f32 %v351_v37, %v342_v35 }
  0xfa   : > { %353 = vst [vmem:[%s734_s10 + $0x1] sm:$0x1] %v352_v38 }
  0xfb   : > { %551 = shalt.err (!%p548_p11)
}
  0xfc   : > { %s552_s27 = scalar_lea.hbm %s366_s9, 32  ;;  %s556_s4 = scalar_lea.hbm %s804_s3, 64 }
  0xfd   : > { %p553_p12 = scmp.ne.s32.totalorder %s366_s9, %s552_s27  ;;  %p557_p1 = scmp.lt.s32.totalorder %s366_s9, %s804_s3 }
  0xfe   : > { %p558_p2 = scmp.lt.s32.totalorder %s556_s4, %s552_s27 }
  0xff   : > { %p554_p13 = pnand %p553_p12, %p703_p3 }
 0x100   : > { %p559_p4 = por %p558_p2, %p557_p1 }
 0x101   : > { %p555_p0 = pneg %p554_p13 }
 0x103   : > { %p560_p5 = pnand %p559_p4, %p555_p0 }
 0x105   : > { %563 = shalt.err (!%p560_p5)
}
 0x106   : > { %466 = dma.vmem_to_hbm [thread:$0]  (%p703_p3), %s369_s30, 32, %s366_s9, %s355_s11  }
 0x107 PF: > { %p472_p6 = scmp.ge.s32.totalorder %s630_s19, 2  ;;  %s380_s15 = sand.u32 1, %s602_s12  }
 0x108   : > { %s381_s7 = scalar_lea.sflag [#allocation3], %s380_s15 }
 0x109   : > { %p469_p7 = pnand %p472_p6, %p713_p9 }
 0x10b   : > { %p470_p8 = pneg %p469_p7 }
 0x10d   : > { %597 = dma.done.wait (%p470_p8), %s381_s7, 32  }
 0x10e   : > { %599 = vsyncadd (%p470_p8), %s381_s7, 4294967264  ;;  %s16_s19 = sadd.s32 1, %s630_s19   ;;  %s807_s12 = smov %s606_s13 }
 0x10f   : > { %p13_p10 = scmp.ge.s32.totalorder %s16_s19, 6   ;;  %s808_s13 = smov %s610_s14 }
 0x110   : > { %s809_s14 = smov %s721_s28  ;;  %s810_s15 = smov %s622_s17 }
 0x111   : > { %s811_s16 = smov %s626_s18  ;;  %s812_s17 = smov %s815_s22 }
 0x112   : > { %s813_s18 = smov %s819_s23  ;;  %15 = sbr.rel (!%p13_p10) target bundleno = 5 (0x5), region = 71 }
 0x117   :  { %386 = vsyncpa [#allocation3], 1 }
 0x118   :  { %388 = vsyncpa [#allocation3 + $0x1], 1 }

</bundles_post_ra>
